<compile_context>
chip_gen: v7x
topology: tpu7x:2x2x1
jax: 0.10.0
libtpu: 0.0.40
codegen_flags: <defaults>
</compile_context>

<pallas_src>
import math
import numpy as np

import jax
import jax.numpy as jnp
from jax import lax
from jax.experimental import pallas as pl
from jax.experimental.pallas import tpu as pltpu


def _bilinear_upsample_matrix(n_in, scale=2):
    """Dense (n_in*scale, n_in) matrix reproducing torch Upsample(bilinear, align_corners=False)."""
    n_out = n_in * scale
    m = np.zeros((n_out, n_in), dtype=np.float32)
    for j in range(n_out):
        c = (j + 0.5) / scale - 0.5
        i0 = int(math.floor(c))
        w1 = c - i0
        w0 = 1.0 - w1
        i0c = min(max(i0, 0), n_in - 1)
        i1c = min(max(i0 + 1, 0), n_in - 1)
        m[j, i0c] += w0
        m[j, i1c] += w1
    return m


def _upsampling_add_kernel(x_ref, w_ref, up_ref, gamma_ref, beta_ref, skip_ref, out_ref):
    # x_ref:     (C_in,  H*W)      VMEM, lane-dense input slab
    # w_ref:     (C_out, C_in)     VMEM, 1x1 conv weight
    # up_ref:    (H*W,   H2*W2)    VMEM, kron(UH, UW)^T  (fused separable bilinear x2)
    # gamma/beta:(C_out, 1)        VMEM, GroupNorm affine
    # skip_ref / out_ref: (C_out, H2*W2)  VMEM, lane-dense (HBM-aliased)

    # ---- 1x1 conv first (pointwise + linear commutes exactly with the upsample) ----
    y0 = jnp.dot(w_ref[...], x_ref[...], preferred_element_type=jnp.float32)   # (C_out, H*W)

    # ---- bilinear x2 upsample: ONE lane-dense MXU matmul, no relayout ----
    y = jnp.dot(y0, up_ref[...], preferred_element_type=jnp.float32)           # (C_out, H2*W2)

    # ---- GroupNorm(num_groups=1): single-pass f32 stats, affine folded ----
    c_out, hw2 = y.shape
    inv_n = 1.0 / float(c_out * hw2)
    s = jnp.sum(y)
    ss = jnp.sum(y * y)
    mean = s * inv_n
    var = jnp.maximum(ss * inv_n - mean * mean, 0.0)   # guard tiny negative from cancellation
    inv_std = lax.rsqrt(var + 1e-5)
    scale = gamma_ref[...] * inv_std                   # (C_out, 1)
    shift = beta_ref[...] - mean * scale               # (C_out, 1)

    # ---- fused epilogue: normalize + affine + residual add, single dense store ----
    out_ref[...] = (y * scale + shift + skip_ref[...]).astype(out_ref.dtype)


def upsampling_add(x, x_skip, w, gamma, beta, scale_factor=2):
    n, c_in, h, wd = x.shape
    n2, c_out, h2, w2 = x_skip.shape
    assert n == n2 and h2 == h * scale_factor and w2 == wd * scale_factor
    assert w.shape == (c_out, c_in)

    # Host-side constant: fused separable bilinear matrix (H*W, H2*W2).
    uh = _bilinear_upsample_matrix(h, scale_factor)        # (H2, H)
    uw = _bilinear_upsample_matrix(wd, scale_factor)       # (W2, W)
    up = jnp.asarray(np.kron(uh, uw).T)                    # (H*W, H2*W2)

    # Layout plumbing (free reshapes in HBM): lane-dense slabs, 2-D affine params.
    x2 = x.reshape(n, c_in, h * wd)
    skip2 = x_skip.reshape(n, c_out, h2 * w2)
    gamma2 = gamma.reshape(c_out, 1)
    beta2 = beta.reshape(c_out, 1)

    grid_spec = pltpu.PrefetchScalarGridSpec(
        num_scalar_prefetch=0,
        grid=(n,),
        in_specs=[
            pl.BlockSpec((pl.Squeezed(), c_in, h * wd), lambda b: (b, 0, 0)),
            pl.BlockSpec((c_out, c_in), lambda b: (0, 0)),
            pl.BlockSpec((h * wd, h2 * w2), lambda b: (0, 0)),
            pl.BlockSpec((c_out, 1), lambda b: (0, 0)),
            pl.BlockSpec((c_out, 1), lambda b: (0, 0)),
            pl.BlockSpec((pl.Squeezed(), c_out, h2 * w2), lambda b: (b, 0, 0)),
        ],
        out_specs=pl.BlockSpec((pl.Squeezed(), c_out, h2 * w2), lambda b: (b, 0, 0)),
    )

    flops = 2 * n * (c_out * c_in * h * wd             # 1x1 conv at LOW resolution
                     + c_out * (h * wd) * (h2 * w2))   # fused upsample matmul
    flops += 6 * n * c_out * h2 * w2                   # GN stats / affine / residual
    bytes_accessed = 4 * (int(x.size) + int(w.size) + int(up.size)
                          + int(gamma.size) + int(beta.size) + 2 * int(x_skip.size))

    out2 = pl.pallas_call(
        _upsampling_add_kernel,
        out_shape=jax.ShapeDtypeStruct((n, c_out, h2 * w2), x_skip.dtype),
        grid_spec=grid_spec,
        input_output_aliases={5: 0},   # skip slab (6th input) aliases the output slab
        compiler_params=pltpu.CompilerParams(dimension_semantics=("parallel",)),
        cost_estimate=pl.CostEstimate(flops=flops, transcendentals=n,
                                      bytes_accessed=bytes_accessed),
    )(x2, w, up, gamma2, beta2, skip2)

    return out2.reshape(n, c_out, h2, w2)


def _reference(x, x_skip, w, gamma, beta, scale=2):
    n, c_in, h, wdim = x.shape
    up = jax.image.resize(x, (n, c_in, h * scale, wdim * scale), method="bilinear")
    y = jnp.einsum("oc,nchw->nohw", w, up)
    mean = y.mean(axis=(1, 2, 3), keepdims=True)
    var = y.var(axis=(1, 2, 3), keepdims=True)
    yn = (y - mean) / jnp.sqrt(var + 1e-5)
    yn = yn * gamma[None, :, None, None] + beta[None, :, None, None]
    return yn + x_skip


if __name__ == "__main__":
    N, C_IN, C_OUT, H, W = 2, 8, 4, 16, 16

    key = jax.random.PRNGKey(0)
    k1, k2, k3, k4, k5 = jax.random.split(key, 5)
    x = jax.random.normal(k1, (N, C_IN, H, W), jnp.float32)
    x_skip = jax.random.normal(k2, (N, C_OUT, 2 * H, 2 * W), jnp.float32)
    # deterministic synthetic parameters (Conv2d 1x1 weight, GroupNorm affine)
    w = jax.random.normal(k3, (C_OUT, C_IN), jnp.float32) / math.sqrt(C_IN)
    gamma = 1.0 + 0.1 * jax.random.normal(k4, (C_OUT,), jnp.float32)
    beta = 0.05 * jax.random.normal(k5, (C_OUT,), jnp.float32)

    fn = jax.jit(upsampling_add)
    out = jax.block_until_ready(fn(x, x_skip, w, gamma, beta))
    ref = jax.block_until_ready(_reference(x, x_skip, w, gamma, beta))
    np.testing.assert_allclose(np.asarray(out), np.asarray(ref), atol=2e-4, rtol=2e-4)

    print("KERNEL_OK")
</pallas_src>

<mosaic_0001>
module attributes {stable_mosaic.version = 11 : i64} {
  func.func @_upsampling_add_kernel(%arg0: i32, %arg1: memref<1x8x256xf32, #tpu.memory_space<vmem>>, %arg2: memref<4x8xf32, #tpu.memory_space<vmem>>, %arg3: memref<256x1024xf32, #tpu.memory_space<vmem>>, %arg4: memref<4x1xf32, #tpu.memory_space<vmem>>, %arg5: memref<4x1xf32, #tpu.memory_space<vmem>>, %arg6: memref<1x4x1024xf32, #tpu.memory_space<vmem>>, %arg7: memref<1x4x1024xf32, #tpu.memory_space<vmem>>) attributes {dimension_semantics = [#tpu.dimension_semantics<parallel>], iteration_bounds = array<i64: 2>, scalar_prefetch = 0 : i64, scratch_operands = 0 : i64, tpu.core_type = #tpu.core_type<tc>, window_params = [{transform_indices = @transform_0, window_bounds = array<i64: 1, 8, 256>}, {pipeline_mode = #tpu.pipeline_mode<synchronous>, transform_indices = @transform_1, window_bounds = array<i64: 4, 8>}, {pipeline_mode = #tpu.pipeline_mode<synchronous>, transform_indices = @transform_2, window_bounds = array<i64: 256, 1024>}, {pipeline_mode = #tpu.pipeline_mode<synchronous>, transform_indices = @transform_3, window_bounds = array<i64: 4, 1>}, {pipeline_mode = #tpu.pipeline_mode<synchronous>, transform_indices = @transform_4, window_bounds = array<i64: 4, 1>}, {transform_indices = @transform_5, window_bounds = array<i64: 1, 4, 1024>}, {transform_indices = @transform_6, window_bounds = array<i64: 1, 4, 1024>}]} {
    %c0 = arith.constant 0 : index
    %c0_0 = arith.constant 0 : index
    %0 = vector.load %arg2[%c0, %c0_0] : memref<4x8xf32, #tpu.memory_space<vmem>>, vector<4x8xf32>
    %c0_1 = arith.constant 0 : index
    %c0_2 = arith.constant 0 : index
    %c0_3 = arith.constant 0 : index
    %1 = vector.load %arg1[%c0_1, %c0_2, %c0_3] : memref<1x8x256xf32, #tpu.memory_space<vmem>>, vector<1x8x256xf32>
    %2 = vector.shape_cast %1 : vector<1x8x256xf32> to vector<8x256xf32>
    %cst = arith.constant dense<0.000000e+00> : vector<4x256xf32>
    %3 = tpu.matmul %0, %2, %cst {dimension_numbers = #tpu.dot_dimension_numbers<[1], [0], [0], [1], [0, 0, 1, 1], [], []>} : vector<4x8xf32>, vector<8x256xf32>, vector<4x256xf32> -> vector<4x256xf32>
    %c0_4 = arith.constant 0 : index
    %c0_5 = arith.constant 0 : index
    %4 = vector.load %arg3[%c0_4, %c0_5] : memref<256x1024xf32, #tpu.memory_space<vmem>>, vector<256x1024xf32>
    %cst_6 = arith.constant dense<0.000000e+00> : vector<4x1024xf32>
    %5 = tpu.matmul %3, %4, %cst_6 {dimension_numbers = #tpu.dot_dimension_numbers<[1], [0], [0], [1], [0, 0, 1, 1], [], []>} : vector<4x256xf32>, vector<256x1024xf32>, vector<4x1024xf32> -> vector<4x1024xf32>
    %6 = vector.shape_cast %5 : vector<4x1024xf32> to vector<1x4x1024xf32>
    %cst_7 = arith.constant dense<0.000000e+00> : vector<1xf32>
    %7 = vector.multi_reduction <add>, %6, %cst_7 [1, 2] : vector<1x4x1024xf32> to vector<1xf32>
    %8 = vector.shape_cast %7 : vector<1xf32> to vector<1x1x1xf32>
    %9 = vector.extract %8[0, 0, 0] : f32 from vector<1x1x1xf32>
    %10 = arith.mulf %5, %5 : vector<4x1024xf32>
    %11 = vector.shape_cast %10 : vector<4x1024xf32> to vector<1x4x1024xf32>
    %cst_8 = arith.constant dense<0.000000e+00> : vector<1xf32>
    %12 = vector.multi_reduction <add>, %11, %cst_8 [1, 2] : vector<1x4x1024xf32> to vector<1xf32>
    %13 = vector.shape_cast %12 : vector<1xf32> to vector<1x1x1xf32>
    %14 = vector.extract %13[0, 0, 0] : f32 from vector<1x1x1xf32>
    %cst_9 = arith.constant 2.44140625E-4 : f32
    %15 = arith.mulf %9, %cst_9 : f32
    %cst_10 = arith.constant 2.44140625E-4 : f32
    %16 = arith.mulf %14, %cst_10 : f32
    %17 = arith.mulf %15, %15 : f32
    %18 = arith.subf %16, %17 : f32
    %cst_11 = arith.constant 0.000000e+00 : f32
    %19 = arith.maximumf %18, %cst_11 : f32
    %cst_12 = arith.constant 9.99999974E-6 : f32
    %20 = arith.addf %19, %cst_12 : f32
    %21 = math.rsqrt %20 : f32
    %c0_13 = arith.constant 0 : index
    %c0_14 = arith.constant 0 : index
    %22 = vector.load %arg4[%c0_13, %c0_14] : memref<4x1xf32, #tpu.memory_space<vmem>>, vector<4x1xf32>
    %23 = vector.broadcast %21 : f32 to vector<4x1xf32>
    %24 = arith.mulf %22, %23 : vector<4x1xf32>
    %c0_15 = arith.constant 0 : index
    %c0_16 = arith.constant 0 : index
    %25 = vector.load %arg5[%c0_15, %c0_16] : memref<4x1xf32, #tpu.memory_space<vmem>>, vector<4x1xf32>
    %26 = vector.broadcast %15 : f32 to vector<4x1xf32>
    %27 = arith.mulf %26, %24 : vector<4x1xf32>
    %28 = arith.subf %25, %27 : vector<4x1xf32>
    %29 = vector.broadcast %24 : vector<4x1xf32> to vector<4x1024xf32>
    %30 = arith.mulf %5, %29 : vector<4x1024xf32>
    %31 = vector.broadcast %28 : vector<4x1xf32> to vector<4x1024xf32>
    %32 = arith.addf %30, %31 : vector<4x1024xf32>
    %c0_17 = arith.constant 0 : index
    %c0_18 = arith.constant 0 : index
    %c0_19 = arith.constant 0 : index
    %33 = vector.load %arg6[%c0_17, %c0_18, %c0_19] : memref<1x4x1024xf32, #tpu.memory_space<vmem>>, vector<1x4x1024xf32>
    %34 = vector.shape_cast %33 : vector<1x4x1024xf32> to vector<4x1024xf32>
    %35 = arith.addf %32, %34 : vector<4x1024xf32>
    %c0_20 = arith.constant 0 : index
    %c0_21 = arith.constant 0 : index
    %c0_22 = arith.constant 0 : index
    %36 = vector.load %arg7[%c0_20, %c0_21, %c0_22] : memref<1x4x1024xf32, #tpu.memory_space<vmem>>, vector<1x4x1024xf32>
    %37 = vector.shape_cast %36 : vector<1x4x1024xf32> to vector<4x1024xf32>
    %38 = vector.shape_cast %35 : vector<4x1024xf32> to vector<1x4x1024xf32>
    tpu.vector_store %arg7[%c0_20, %c0_21, %c0_22], %38 {strides = array<i32>} : memref<1x4x1024xf32, #tpu.memory_space<vmem>>, vector<1x4x1024xf32>,
    return
  }
  func.func @transform_0(%arg0: i32) -> (i32, i32, i32) {
    %c0_i32 = arith.constant 0 : i32
    %c0_i32_0 = arith.constant 0 : i32
    %c0_i32_1 = arith.constant 0 : i32
    return %arg0, %c0_i32, %c0_i32_0 : i32, i32, i32
  }
  func.func @transform_1(%arg0: i32) -> (i32, i32) {
    %c0_i32 = arith.constant 0 : i32
    %c0_i32_0 = arith.constant 0 : i32
    %c0_i32_1 = arith.constant 0 : i32
    return %c0_i32, %c0_i32_0 : i32, i32
  }
  func.func @transform_2(%arg0: i32) -> (i32, i32) {
    %c0_i32 = arith.constant 0 : i32
    %c0_i32_0 = arith.constant 0 : i32
    %c0_i32_1 = arith.constant 0 : i32
    return %c0_i32, %c0_i32_0 : i32, i32
  }
  func.func @transform_3(%arg0: i32) -> (i32, i32) {
    %c0_i32 = arith.constant 0 : i32
    %c0_i32_0 = arith.constant 0 : i32
    %c0_i32_1 = arith.constant 0 : i32
    return %c0_i32, %c0_i32_0 : i32, i32
  }
  func.func @transform_4(%arg0: i32) -> (i32, i32) {
    %c0_i32 = arith.constant 0 : i32
    %c0_i32_0 = arith.constant 0 : i32
    %c0_i32_1 = arith.constant 0 : i32
    return %c0_i32, %c0_i32_0 : i32, i32
  }
  func.func @transform_5(%arg0: i32) -> (i32, i32, i32) {
    %c0_i32 = arith.constant 0 : i32
    %c0_i32_0 = arith.constant 0 : i32
    %c0_i32_1 = arith.constant 0 : i32
    return %arg0, %c0_i32, %c0_i32_0 : i32, i32, i32
  }
  func.func @transform_6(%arg0: i32) -> (i32, i32, i32) {
    %c0_i32 = arith.constant 0 : i32
    %c0_i32_0 = arith.constant 0 : i32
    %c0_i32_1 = arith.constant 0 : i32
    return %arg0, %c0_i32, %c0_i32_0 : i32, i32, i32
  }
}

</mosaic_0001>

<bundles_post_ra>
// kernel: upsampling_add.1
= control target key start
LH: loop header
LB: loop body
LE: loop exit
PB: predicated region body
PF: predicated region fallthrough
CT: control target
= control target key end

     0   :  { %11 = vsyncpa [#allocation3], 0  ;;  %s1521_s21 = smov 0   ;;  %s1667_s0 = inlined_call_operand.vmem [shape: f32[2,8,256], index: 0, kind: input, shape index: {}]   ;;  %s1668_s1 = inlined_call_operand.vmem [shape: f32[4,8], index: 1, kind: input, shape index: {}]   ;;  %s1669_s2 = inlined_call_operand.hbm [shape: f32[256,1024], index: 2, kind: input, shape index: {}]   ;;  %s1670_s3 = inlined_call_operand.vmem [shape: f32[4,1], index: 3, kind: input, shape index: {}]   ;;  %s1671_s4 = inlined_call_operand.vmem [shape: f32[4,1], index: 4, kind: input, shape index: {}]   ;;  %s1672_s5 = inlined_call_operand.vmem [shape: f32[2,4,1024], index: 5, kind: input, shape index: {}, may-alias: {5,6}]   ;;  %s1673_s6 = inlined_call_operand.vmem [shape: f32[2,4,1024], index: 6, kind: output, shape index: {}, may-alias: {5,6}]  }
   0x1 LB: > { %s1527_s22 = sadd.s32 4294967295, %s1478_s21   ;;  %p1129_p0 = scmp.ge.s32.totalorder %s1478_s21, 1  ;;  %s1478_s21 = sphi %s1521_s21, %s17_s21  }
   0x2   : > { %p184_p1 = scmp.lt.s32.totalorder %s1478_s21, 3  ;;  %s1480_s23 = smov [#allocation2]  }
   0x3   : > { %s199_s24 = sshll.u32 %s1480_s23, 4  ;;  %p1674_p3 = scmp.eq.s32.totalorder %s1527_s22, 0  ;;  %s200_s24 = int_to_ptr.vmem [resolvable:$true] %s199_s24 }
   0x4   : > { %p1531_p2 = pnand %p1129_p0, %p184_p1  ;;  %s1440_s29 = scalar_lea.hbm %s1669_s2, 32768 }
   0x5   : > { %p1441_p6 = scmp.ne.s32.totalorder %s1669_s2, %s1440_s29  ;;  %p1447_p10 = scmp.lt.u32.totalorder %s1440_s29, %s1669_s2 }
   0x6   : > { %s1676_s25 = scalar_select %p1531_p2, 1, 0 }
   0x7   : > { %p1412_p4 = pneg %p1531_p2 }
   0x9   : > { %p1540_p5 = pnand %p1674_p3, %p1412_p4 }
   0xb   : > { %p1442_p7 = pneg %p1540_p5 }
   0xd   : > { %p1443_p8 = pnand %p1442_p7, %p1441_p6 }
   0xf   : > { %p1444_p9 = pneg %p1443_p8 }
  0x11   : > { %p1449_p11 = pnand %p1447_p10, %p1444_p9 }
  0x13   : > { %1452 = shalt.err (!%p1449_p11)
}
  0x14   : > { %s1453_s10 = scalar_lea.vmem %s200_s24, 32768  ;;  %p1461_p1 = scmp.lt.s32.totalorder %s200_s24, %s200_s24 }
  0x15   : > { %p1454_p12 = scmp.ne.s32.totalorder %s200_s24, %s1453_s10  ;;  %p1462_p4 = scmp.lt.s32.totalorder %s1453_s10, %s1453_s10 }
  0x17   : > { %p1456_p13 = pnand %p1454_p12, %p1442_p7  ;;  %p1463_p3 = por %p1462_p4, %p1461_p1 }
  0x19   : > { %p1457_p0 = pneg %p1456_p13 }
  0x1b   : > { %p1464_p2 = pnand %p1463_p3, %p1457_p0 }
  0x1d   : > { %1467 = shalt.err (!%p1464_p2)
}
  0x1e   : > { %s1481_s11 = smov 1024   ;;  %s1482_s12 = smov 64  }
  0x1f   : > { %1415 = dma.hbm_to_vmem [thread:$0]  (!%p1540_p5), %s1669_s2, 32768, %s200_s24, [#allocation3], %s1481_s11, %s1481_s11, %s1482_s12  }
  0x20   : > { %p1678_p6 = scmp.ne.s32.totalorder %s1676_s25, 0 }
  0x21   : > { %p1679_p8 = scmp.eq.s32.totalorder (!%p1678_p6), %s1527_s22, 0 }
  0x22   : > { %237 = sbr.rel (%p1678_p6) target bundleno = 969 (0x3c9), region = 44 }
  0x29   : > { %1473 = dma.done.wait (%p1679_p8), [#allocation3], 32768   ;;  %p1680_p7 = pmov %p1679_p8 }
  0x2a   : > { %p272_p2 = scmp.lt.s32.totalorder %s1527_s22, 1  ;;  %v1483_v0 = vmov 0.0   ;;  %vm290_vm0 = vcmask 64512   ;;  %v287_v3 = vld [vmem:[%s1668_s1] sm:$0xf]  ;;  %v366_v4 = vld [vmem:[#allocation2 + $0x8] sm:$0xff] }
  0x2b   : > { %1475 = vsyncadd (%p1680_p7), [#allocation3], 4294934528  ;;  %358 = vmatprep.mubr.f32.mxu0 %v1483_v0  ;;  %v374_v5 = vld [vmem:[#allocation2 + $0x48] sm:$0xff]  ;;  %v368_v7 = vld [vmem:[#allocation2 + $0x18] sm:$0xff]  ;;  %vm905_vm1 = vcmask 1043456   ;;  %s1485_s29 = smov 0.0  }
  0x2c   : > { %s1682_s22 = smov (!%p272_p2, %s1527_s22), 1  ;;  %v1146_v6 = vpack.c.bf16 %v374_v5, %v366_v4  ;;  %v376_v8 = vld [vmem:[#allocation2 + $0x58] sm:$0xff]  ;;  %v365_v9 = vld [vmem:[#allocation2] sm:$0xff]  ;;  %v367_v12 = vld [vmem:[#allocation2 + $0x10] sm:$0xff] }
  0x2d   : > { %s1143_s15 = sshll.u32 %s1682_s22, 4  ;;  %v1210_v10 = vpack.c.bf16 %v376_v8, %v368_v7  ;;  %v373_v11 = vld [vmem:[#allocation2 + $0x40] sm:$0xff]  ;;  %v375_v13 = vld [vmem:[#allocation2 + $0x50] sm:$0xff]  ;;  %v382_v16 = vld [vmem:[#allocation2 + $0x88] sm:$0xff]  ;;  %s1144_s13 = sshll.u32 %s1682_s22, 5 }
  0x2e   : > { %s276_s18 = scalar_lea.vmem %s1667_s0, %s1143_s15  ;;  %1147 = vmatprep.subr.bf16.mxu1 %v1146_v6  ;;  %v1148_v14 = vpack.c.bf16 %v373_v11, %v365_v9  ;;  %v1212_v15 = vpack.c.bf16 %v375_v13, %v367_v12  ;;  %v390_v17 = vld [vmem:[#allocation2 + $0xc8] sm:$0xff]  ;;  %v384_v18 = vld [vmem:[#allocation2 + $0x98] sm:$0xff]  ;;  %v381_v21 = vld [vmem:[#allocation2 + $0x80] sm:$0xff]  ;;  %s281_s16 = scalar_lea.vmem %s1672_s5, %s1144_s13 }
  0x2f   : > { %v289_v1 = vld [vmem:[%s276_s18 + $0x8] sm:$0xff]  ;;  %v288_v2 = vld [vmem:[%s276_s18] sm:$0xff]  ;;  %v1150_v19 = vpack.c.bf16 %v390_v17, %v382_v16  ;;  %v392_v20 = vld [vmem:[#allocation2 + $0xd8] sm:$0xff]  ;;  %s286_s19 = scalar_lea.vmem %s1673_s6, %s1144_s13 }
  0x30   : > { %294 = vmatprep.subr.mxu0 %v289_v1  ;;  %v389_v22 = vld [vmem:[#allocation2 + $0xc0] sm:$0xff]  ;;  %1149 = vmatpush1.bf16.msra.mxu1 %v1148_v14  ;;  %v1214_v23 = vpack.c.bf16 %v392_v20, %v384_v18  ;;  %v383_v25 = vld [vmem:[#allocation2 + $0x90] sm:$0xff]  ;;  %v398_v27 = vld [vmem:[#allocation2 + $0x108] sm:$0xff] }
  0x31   : > { %295 = vmatpush1.msra.mxu0 %v288_v2  ;;  %v1152_v24 = vpack.c.bf16 %v389_v22, %v381_v21  ;;  %v391_v26 = vld [vmem:[#allocation2 + $0xd0] sm:$0xff]  ;;  %1151 = vmatprep.subr.bf16.mxu1 %v1150_v19  ;;  %v406_v29 = vld [vmem:[#allocation2 + $0x148] sm:$0xff]  ;;  %v400_v30 = vld [vmem:[#allocation2 + $0x118] sm:$0xff] }
  0x32   : > { %1140 = vmatmul.mubr.msk.f32.vlgmr.msra.gmra.mrb[0].mxu0 %vm290_vm0, %v287_v3  ;;  %1211 = vmatprep.subr.bf16.mxu0 %v1210_v10  ;;  %v1216_v28 = vpack.c.bf16 %v391_v26, %v383_v25  ;;  %v408_v31 = vld [vmem:[#allocation2 + $0x158] sm:$0xff]  ;;  %v1154_v32 = vpack.c.bf16 %v406_v29, %v398_v27  ;;  %v397_v34 = vld [vmem:[#allocation2 + $0x100] sm:$0xff]  ;;  %v399_v36 = vld [vmem:[#allocation2 + $0x110] sm:$0xff] }
  0x33   : > { %1213 = vmatpush1.bf16.msra.mxu0 %v1212_v15  ;;  %v1218_v33 = vpack.c.bf16 %v408_v31, %v400_v30  ;;  %v405_v35 = vld [vmem:[#allocation2 + $0x140] sm:$0xff]  ;;  %v407_v37 = vld [vmem:[#allocation2 + $0x150] sm:$0xff]  ;;  %v414_v38 = vld [vmem:[#allocation2 + $0x188] sm:$0xff] }
  0x34   : > { %1215 = vmatprep.subr.bf16.mxu0 %v1214_v23  ;;  %v422_v39 = vld [vmem:[#allocation2 + $0x1c8] sm:$0xff]  ;;  %1153 = vmatpush1.bf16.msra.mxu1 %v1152_v24  ;;  %v1156_v40 = vpack.c.bf16 %v405_v35, %v397_v34  ;;  %v1220_v41 = vpack.c.bf16 %v407_v37, %v399_v36  ;;  %v416_v42 = vld [vmem:[#allocation2 + $0x198] sm:$0xff]  ;;  %v413_v44 = vld [vmem:[#allocation2 + $0x180] sm:$0xff] }
  0x35   : > { %v424_v43 = vld [vmem:[#allocation2 + $0x1d8] sm:$0xff]  ;;  %1155 = vmatprep.subr.bf16.mxu1 %v1154_v32  ;;  %v1158_v45 = vpack.c.bf16 %v422_v39, %v414_v38  ;;  %v421_v47 = vld [vmem:[#allocation2 + $0x1c0] sm:$0xff]  ;;  %v415_v48 = vld [vmem:[#allocation2 + $0x190] sm:$0xff] }
  0x36   : > { %v1222_v46 = vpack.c.bf16 %v424_v43, %v416_v42  ;;  %v423_v49 = vld [vmem:[#allocation2 + $0x1d0] sm:$0xff]  ;;  %v430_v50 = vld [vmem:[#allocation2 + $0x208] sm:$0xff]  ;;  %v432_v52 = vld [vmem:[#allocation2 + $0x218] sm:$0xff]  ;;  %v1160_v54 = vpack.c.bf16 %v421_v47, %v413_v44 }
  0x37   : > { %1217 = vmatpush1.bf16.msra.mxu0 %v1216_v28  ;;  %v438_v51 = vld [vmem:[#allocation2 + $0x248] sm:$0xff]  ;;  %v440_v53 = vld [vmem:[#allocation2 + $0x258] sm:$0xff]  ;;  %v1224_v55 = vpack.c.bf16 %v423_v49, %v415_v48  ;;  %v429_v56 = vld [vmem:[#allocation2 + $0x200] sm:$0xff] }
  0x38   : > { %1219 = vmatprep.subr.bf16.mxu0 %v1218_v33  ;;  %1157 = vmatpush1.bf16.msra.mxu1 %v1156_v40  ;;  %v437_v57 = vld [vmem:[#allocation2 + $0x240] sm:$0xff]  ;;  %v1162_v58 = vpack.c.bf16 %v438_v51, %v430_v50  ;;  %v1226_v59 = vpack.c.bf16 %v440_v53, %v432_v52  ;;  %v431_v60 = vld [vmem:[#allocation2 + $0x210] sm:$0xff]  ;;  %v446_v62 = vld [vmem:[#allocation2 + $0x288] sm:$0xff] }
  0x39   : > { %1159 = vmatprep.subr.bf16.mxu1 %v1158_v45  ;;  %v439_v61 = vld [vmem:[#allocation2 + $0x250] sm:$0xff]  ;;  %v454_v63 = vld [vmem:[#allocation2 + $0x2c8] sm:$0xff]  ;;  %v448_v0 = vld [vmem:[#allocation2 + $0x298] sm:$0xff]  ;;  %v1164_v2 = vpack.c.bf16 %v437_v57, %v429_v56 }
  0x3a   : > { %v456_v1 = vld [vmem:[#allocation2 + $0x2d8] sm:$0xff]  ;;  %v1228_v3 = vpack.c.bf16 %v439_v61, %v431_v60  ;;  %v445_v4 = vld [vmem:[#allocation2 + $0x280] sm:$0xff]  ;;  %v1166_v6 = vpack.c.bf16 %v454_v63, %v446_v62  ;;  %v447_v8 = vld [vmem:[#allocation2 + $0x290] sm:$0xff] }
  0x3b   : > { %1221 = vmatpush1.bf16.msra.mxu0 %v1220_v41  ;;  %v453_v5 = vld [vmem:[#allocation2 + $0x2c0] sm:$0xff]  ;;  %v1230_v7 = vpack.c.bf16 %v456_v1, %v448_v0  ;;  %v455_v9 = vld [vmem:[#allocation2 + $0x2d0] sm:$0xff]  ;;  %v462_v10 = vld [vmem:[#allocation2 + $0x308] sm:$0xff] }
  0x3c   : > { %1223 = vmatprep.subr.bf16.mxu0 %v1222_v46  ;;  %1161 = vmatpush1.bf16.msra.mxu1 %v1160_v54  ;;  %v470_v11 = vld [vmem:[#allocation2 + $0x348] sm:$0xff]  ;;  %v464_v12 = vld [vmem:[#allocation2 + $0x318] sm:$0xff]  ;;  %v1168_v14 = vpack.c.bf16 %v453_v5, %v445_v4  ;;  %v1232_v15 = vpack.c.bf16 %v455_v9, %v447_v8  ;;  %v461_v16 = vld [vmem:[#allocation2 + $0x300] sm:$0xff] }
  0x3d   : > { %1163 = vmatprep.subr.bf16.mxu1 %v1162_v58  ;;  %v472_v13 = vld [vmem:[#allocation2 + $0x358] sm:$0xff]  ;;  %v469_v17 = vld [vmem:[#allocation2 + $0x340] sm:$0xff]  ;;  %v1170_v18 = vpack.c.bf16 %v470_v11, %v462_v10  ;;  %v463_v20 = vld [vmem:[#allocation2 + $0x310] sm:$0xff] }
  0x3e   : > { %v1234_v19 = vpack.c.bf16 %v472_v13, %v464_v12  ;;  %v471_v21 = vld [vmem:[#allocation2 + $0x350] sm:$0xff]  ;;  %v478_v22 = vld [vmem:[#allocation2 + $0x388] sm:$0xff]  ;;  %v480_v24 = vld [vmem:[#allocation2 + $0x398] sm:$0xff]  ;;  %v1172_v26 = vpack.c.bf16 %v469_v17, %v461_v16 }
  0x3f   : > { %1225 = vmatpush1.bf16.msra.mxu0 %v1224_v55  ;;  %v486_v23 = vld [vmem:[#allocation2 + $0x3c8] sm:$0xff]  ;;  %v488_v25 = vld [vmem:[#allocation2 + $0x3d8] sm:$0xff]  ;;  %v1236_v27 = vpack.c.bf16 %v471_v21, %v463_v20  ;;  %v477_v28 = vld [vmem:[#allocation2 + $0x380] sm:$0xff] }
  0x40   : > { %1227 = vmatprep.subr.bf16.mxu0 %v1226_v59  ;;  %1165 = vmatpush1.bf16.msra.mxu1 %v1164_v2  ;;  %v485_v29 = vld [vmem:[#allocation2 + $0x3c0] sm:$0xff]  ;;  %v1174_v30 = vpack.c.bf16 %v486_v23, %v478_v22  ;;  %v1238_v31 = vpack.c.bf16 %v488_v25, %v480_v24  ;;  %v479_v32 = vld [vmem:[#allocation2 + $0x390] sm:$0xff]  ;;  %v494_v34 = vld [vmem:[#allocation2 + $0x408] sm:$0xff] }
  0x41   : > { %1167 = vmatprep.subr.bf16.mxu1 %v1166_v6  ;;  %v487_v33 = vld [vmem:[#allocation2 + $0x3d0] sm:$0xff]  ;;  %v502_v35 = vld [vmem:[#allocation2 + $0x448] sm:$0xff]  ;;  %v496_v36 = vld [vmem:[#allocation2 + $0x418] sm:$0xff]  ;;  %v1176_v38 = vpack.c.bf16 %v485_v29, %v477_v28 }
  0x42   : > { %v504_v37 = vld [vmem:[#allocation2 + $0x458] sm:$0xff]  ;;  %v1240_v39 = vpack.c.bf16 %v487_v33, %v479_v32  ;;  %v493_v40 = vld [vmem:[#allocation2 + $0x400] sm:$0xff]  ;;  %v1178_v42 = vpack.c.bf16 %v502_v35, %v494_v34  ;;  %v495_v44 = vld [vmem:[#allocation2 + $0x410] sm:$0xff] }
  0x43   : > { %1229 = vmatpush1.bf16.msra.mxu0 %v1228_v3  ;;  %v501_v41 = vld [vmem:[#allocation2 + $0x440] sm:$0xff]  ;;  %v1242_v43 = vpack.c.bf16 %v504_v37, %v496_v36  ;;  %v503_v45 = vld [vmem:[#allocation2 + $0x450] sm:$0xff]  ;;  %v510_v46 = vld [vmem:[#allocation2 + $0x488] sm:$0xff] }
  0x44   : > { %1231 = vmatprep.subr.bf16.mxu0 %v1230_v7  ;;  %1169 = vmatpush1.bf16.msra.mxu1 %v1168_v14  ;;  %v518_v47 = vld [vmem:[#allocation2 + $0x4c8] sm:$0xff]  ;;  %v512_v48 = vld [vmem:[#allocation2 + $0x498] sm:$0xff]  ;;  %v1180_v50 = vpack.c.bf16 %v501_v41, %v493_v40  ;;  %v1244_v51 = vpack.c.bf16 %v503_v45, %v495_v44  ;;  %v509_v52 = vld [vmem:[#allocation2 + $0x480] sm:$0xff] }
  0x45   : > { %1171 = vmatprep.subr.bf16.mxu1 %v1170_v18  ;;  %v520_v49 = vld [vmem:[#allocation2 + $0x4d8] sm:$0xff]  ;;  %v517_v53 = vld [vmem:[#allocation2 + $0x4c0] sm:$0xff]  ;;  %v1182_v54 = vpack.c.bf16 %v518_v47, %v510_v46  ;;  %v511_v56 = vld [vmem:[#allocation2 + $0x490] sm:$0xff] }
  0x46   : > { %v1246_v55 = vpack.c.bf16 %v520_v49, %v512_v48  ;;  %v519_v57 = vld [vmem:[#allocation2 + $0x4d0] sm:$0xff]  ;;  %v526_v58 = vld [vmem:[#allocation2 + $0x508] sm:$0xff]  ;;  %v528_v60 = vld [vmem:[#allocation2 + $0x518] sm:$0xff]  ;;  %v1184_v62 = vpack.c.bf16 %v517_v53, %v509_v52 }
  0x47   : > { %1233 = vmatpush1.bf16.msra.mxu0 %v1232_v15  ;;  %v534_v59 = vld [vmem:[#allocation2 + $0x548] sm:$0xff]  ;;  %v536_v61 = vld [vmem:[#allocation2 + $0x558] sm:$0xff]  ;;  %v1248_v63 = vpack.c.bf16 %v519_v57, %v511_v56  ;;  %v525_v0 = vld [vmem:[#allocation2 + $0x500] sm:$0xff] }
  0x48   : > { %1235 = vmatprep.subr.bf16.mxu0 %v1234_v19  ;;  %1173 = vmatpush1.bf16.msra.mxu1 %v1172_v26  ;;  %v533_v1 = vld [vmem:[#allocation2 + $0x540] sm:$0xff]  ;;  %v1186_v2 = vpack.c.bf16 %v534_v59, %v526_v58  ;;  %v1250_v3 = vpack.c.bf16 %v536_v61, %v528_v60  ;;  %v527_v4 = vld [vmem:[#allocation2 + $0x510] sm:$0xff]  ;;  %v542_v6 = vld [vmem:[#allocation2 + $0x588] sm:$0xff] }
  0x49   : > { %1175 = vmatprep.subr.bf16.mxu1 %v1174_v30  ;;  %v535_v5 = vld [vmem:[#allocation2 + $0x550] sm:$0xff]  ;;  %v550_v7 = vld [vmem:[#allocation2 + $0x5c8] sm:$0xff]  ;;  %v544_v8 = vld [vmem:[#allocation2 + $0x598] sm:$0xff]  ;;  %v1188_v10 = vpack.c.bf16 %v533_v1, %v525_v0 }
  0x4a   : > { %v552_v9 = vld [vmem:[#allocation2 + $0x5d8] sm:$0xff]  ;;  %v1252_v11 = vpack.c.bf16 %v535_v5, %v527_v4  ;;  %v541_v12 = vld [vmem:[#allocation2 + $0x580] sm:$0xff]  ;;  %v1190_v14 = vpack.c.bf16 %v550_v7, %v542_v6  ;;  %v543_v16 = vld [vmem:[#allocation2 + $0x590] sm:$0xff] }
  0x4b   : > { %1237 = vmatpush1.bf16.msra.mxu0 %v1236_v27  ;;  %v549_v13 = vld [vmem:[#allocation2 + $0x5c0] sm:$0xff]  ;;  %v1254_v15 = vpack.c.bf16 %v552_v9, %v544_v8  ;;  %v551_v17 = vld [vmem:[#allocation2 + $0x5d0] sm:$0xff]  ;;  %v558_v18 = vld [vmem:[#allocation2 + $0x608] sm:$0xff] }
  0x4c   : > { %1239 = vmatprep.subr.bf16.mxu0 %v1238_v31  ;;  %1177 = vmatpush1.bf16.msra.mxu1 %v1176_v38  ;;  %v566_v19 = vld [vmem:[#allocation2 + $0x648] sm:$0xff]  ;;  %v560_v20 = vld [vmem:[#allocation2 + $0x618] sm:$0xff]  ;;  %v1192_v22 = vpack.c.bf16 %v549_v13, %v541_v12  ;;  %v1256_v23 = vpack.c.bf16 %v551_v17, %v543_v16  ;;  %v557_v24 = vld [vmem:[#allocation2 + $0x600] sm:$0xff] }
  0x4d   : > { %1179 = vmatprep.subr.bf16.mxu1 %v1178_v42  ;;  %v568_v21 = vld [vmem:[#allocation2 + $0x658] sm:$0xff]  ;;  %v565_v25 = vld [vmem:[#allocation2 + $0x640] sm:$0xff]  ;;  %v1194_v26 = vpack.c.bf16 %v566_v19, %v558_v18  ;;  %v559_v28 = vld [vmem:[#allocation2 + $0x610] sm:$0xff] }
  0x4e   : > { %v1258_v27 = vpack.c.bf16 %v568_v21, %v560_v20  ;;  %v567_v29 = vld [vmem:[#allocation2 + $0x650] sm:$0xff]  ;;  %v574_v30 = vld [vmem:[#allocation2 + $0x688] sm:$0xff]  ;;  %v576_v32 = vld [vmem:[#allocation2 + $0x698] sm:$0xff]  ;;  %v1196_v34 = vpack.c.bf16 %v565_v25, %v557_v24 }
  0x4f   : > { %1241 = vmatpush1.bf16.msra.mxu0 %v1240_v39  ;;  %v582_v31 = vld [vmem:[#allocation2 + $0x6c8] sm:$0xff]  ;;  %v584_v33 = vld [vmem:[#allocation2 + $0x6d8] sm:$0xff]  ;;  %v1260_v35 = vpack.c.bf16 %v567_v29, %v559_v28  ;;  %v573_v36 = vld [vmem:[#allocation2 + $0x680] sm:$0xff] }
  0x50   : > { %1243 = vmatprep.subr.bf16.mxu0 %v1242_v43  ;;  %1181 = vmatpush1.bf16.msra.mxu1 %v1180_v50  ;;  %v581_v37 = vld [vmem:[#allocation2 + $0x6c0] sm:$0xff]  ;;  %v1198_v38 = vpack.c.bf16 %v582_v31, %v574_v30  ;;  %v1262_v39 = vpack.c.bf16 %v584_v33, %v576_v32  ;;  %v575_v40 = vld [vmem:[#allocation2 + $0x690] sm:$0xff]  ;;  %v590_v42 = vld [vmem:[#allocation2 + $0x708] sm:$0xff] }
  0x51   : > { %1183 = vmatprep.subr.bf16.mxu1 %v1182_v54  ;;  %v583_v41 = vld [vmem:[#allocation2 + $0x6d0] sm:$0xff]  ;;  %v598_v43 = vld [vmem:[#allocation2 + $0x748] sm:$0xff]  ;;  %v592_v44 = vld [vmem:[#allocation2 + $0x718] sm:$0xff]  ;;  %v1200_v46 = vpack.c.bf16 %v581_v37, %v573_v36 }
  0x52   : > { %v600_v45 = vld [vmem:[#allocation2 + $0x758] sm:$0xff]  ;;  %v1264_v47 = vpack.c.bf16 %v583_v41, %v575_v40  ;;  %v589_v48 = vld [vmem:[#allocation2 + $0x700] sm:$0xff]  ;;  %v1202_v50 = vpack.c.bf16 %v598_v43, %v590_v42  ;;  %v591_v52 = vld [vmem:[#allocation2 + $0x710] sm:$0xff] }
  0x53   : > { %1245 = vmatpush1.bf16.msra.mxu0 %v1244_v51  ;;  %v597_v49 = vld [vmem:[#allocation2 + $0x740] sm:$0xff]  ;;  %v1266_v51 = vpack.c.bf16 %v600_v45, %v592_v44  ;;  %v599_v53 = vld [vmem:[#allocation2 + $0x750] sm:$0xff]  ;;  %v606_v54 = vld [vmem:[#allocation2 + $0x788] sm:$0xff] }
  0x54   : > { %1247 = vmatprep.subr.bf16.mxu0 %v1246_v55  ;;  %1185 = vmatpush1.bf16.msra.mxu1 %v1184_v62  ;;  %v614_v55 = vld [vmem:[#allocation2 + $0x7c8] sm:$0xff]  ;;  %v608_v56 = vld [vmem:[#allocation2 + $0x798] sm:$0xff]  ;;  %v1204_v58 = vpack.c.bf16 %v597_v49, %v589_v48  ;;  %v1268_v59 = vpack.c.bf16 %v599_v53, %v591_v52  ;;  %v605_v60 = vld [vmem:[#allocation2 + $0x780] sm:$0xff] }
  0x55   : > { %1187 = vmatprep.subr.bf16.mxu1 %v1186_v2  ;;  %v616_v57 = vld [vmem:[#allocation2 + $0x7d8] sm:$0xff]  ;;  %v1206_v61 = vpack.c.bf16 %v614_v55, %v606_v54  ;;  %v607_v0 = vld [vmem:[#allocation2 + $0x790] sm:$0xff]  ;;  %v370_v4 = vld [vmem:[#allocation2 + $0x28] sm:$0xff] }
  0x56   : > { %v1270_v62 = vpack.c.bf16 %v616_v57, %v608_v56  ;;  %v615_v1 = vld [vmem:[#allocation2 + $0x7d0] sm:$0xff]  ;;  %v378_v5 = vld [vmem:[#allocation2 + $0x68] sm:$0xff]  ;;  %v372_v6 = vld [vmem:[#allocation2 + $0x38] sm:$0xff] }
  0x57   : > { %1249 = vmatpush1.bf16.msra.mxu0 %v1248_v63  ;;  %v613_v63 = vld [vmem:[#allocation2 + $0x7c0] sm:$0xff]  ;;  %v1274_v7 = vpack.c.bf16 %v378_v5, %v370_v4  ;;  %v380_v8 = vld [vmem:[#allocation2 + $0x78] sm:$0xff]  ;;  %v371_v12 = vld [vmem:[#allocation2 + $0x30] sm:$0xff] }
  0x58   : > { %1251 = vmatprep.subr.bf16.mxu0 %v1250_v3  ;;  %1189 = vmatpush1.bf16.msra.mxu1 %v1188_v10  ;;  %v1208_v2 = vpack.c.bf16 %v613_v63, %v605_v60  ;;  %v1272_v3 = vpack.c.bf16 %v615_v1, %v607_v0  ;;  %v1338_v9 = vpack.c.bf16 %v380_v8, %v372_v6  ;;  %v369_v10 = vld [vmem:[#allocation2 + $0x20] sm:$0xff]  ;;  %v379_v13 = vld [vmem:[#allocation2 + $0x70] sm:$0xff]  ;;  %v388_v16 = vld [vmem:[#allocation2 + $0xb8] sm:$0xff] }
  0x59   : > { %1191 = vmatprep.subr.bf16.mxu1 %v1190_v14  ;;  %v386_v14 = vld [vmem:[#allocation2 + $0xa8] sm:$0xff]  ;;  %v396_v17 = vld [vmem:[#allocation2 + $0xf8] sm:$0xff]  ;;  %v1340_v20 = vpack.c.bf16 %v379_v13, %v371_v12  ;;  %v385_v21 = vld [vmem:[#allocation2 + $0xa0] sm:$0xff] }
  0x5a   : > { %v387_v24 = vld [vmem:[#allocation2 + $0xb0] sm:$0xff]  ;;  %v1342_v28 = vpack.c.bf16 %v396_v17, %v388_v16  ;;  %v410_v29 = vld [vmem:[#allocation2 + $0x168] sm:$0xff]  ;;  %v404_v30 = vld [vmem:[#allocation2 + $0x138] sm:$0xff] }
  0x5b   : > { %1253 = vmatpush1.bf16.msra.mxu0 %v1252_v11  ;;  %v377_v11 = vld [vmem:[#allocation2 + $0x60] sm:$0xff]  ;;  %v395_v25 = vld [vmem:[#allocation2 + $0xf0] sm:$0xff]  ;;  %v412_v31 = vld [vmem:[#allocation2 + $0x178] sm:$0xff] }
  0x5c   : > { %1255 = vmatprep.subr.bf16.mxu0 %v1254_v15  ;;  %1193 = vmatpush1.bf16.msra.mxu1 %v1192_v22  ;;  %v394_v15 = vld [vmem:[#allocation2 + $0xe8] sm:$0xff]  ;;  %v1276_v19 = vpack.c.bf16 %v377_v11, %v369_v10  ;;  %v393_v22 = vld [vmem:[#allocation2 + $0xe0] sm:$0xff]  ;;  %v1344_v33 = vpack.c.bf16 %v395_v25, %v387_v24  ;;  %v1346_v37 = vpack.c.bf16 %v412_v31, %v404_v30  ;;  %v420_v42 = vld [vmem:[#allocation2 + $0x1b8] sm:$0xff] }
  0x5d   : > { %1195 = vmatprep.subr.bf16.mxu1 %v1194_v26  ;;  %v402_v26 = vld [vmem:[#allocation2 + $0x128] sm:$0xff]  ;;  %v1280_v32 = vpack.c.bf16 %v393_v22, %v385_v21  ;;  %v428_v43 = vld [vmem:[#allocation2 + $0x1f8] sm:$0xff]  ;;  %v443_v63 = vld [vmem:[#allocation2 + $0x270] sm:$0xff] }
  0x5e   : > { %v1282_v36 = vpack.c.bf16 %v410_v29, %v402_v26  ;;  %v418_v40 = vld [vmem:[#allocation2 + $0x1a8] sm:$0xff]  ;;  %v1350_v49 = vpack.c.bf16 %v428_v43, %v420_v42  ;;  %v436_v54 = vld [vmem:[#allocation2 + $0x238] sm:$0xff]  ;;  %v449_v6 = vld [vmem:[#allocation2 + $0x2a0] sm:$0xff] }
  0x5f   : > { %1257 = vmatpush1.bf16.msra.mxu0 %v1256_v23  ;;  %v426_v41 = vld [vmem:[#allocation2 + $0x1e8] sm:$0xff]  ;;  %v444_v55 = vld [vmem:[#allocation2 + $0x278] sm:$0xff]  ;;  %v451_v10 = vld [vmem:[#allocation2 + $0x2b0] sm:$0xff] }
  0x60   : > { %1259 = vmatprep.subr.bf16.mxu0 %v1258_v27  ;;  %1197 = vmatpush1.bf16.msra.mxu1 %v1196_v34  ;;  %v1278_v27 = vpack.c.bf16 %v394_v15, %v386_v14  ;;  %v401_v34 = vld [vmem:[#allocation2 + $0x120] sm:$0xff]  ;;  %v1286_v48 = vpack.c.bf16 %v426_v41, %v418_v40  ;;  %v434_v52 = vld [vmem:[#allocation2 + $0x228] sm:$0xff]  ;;  %v459_v11 = vld [vmem:[#allocation2 + $0x2f0] sm:$0xff] }
  0x61   : > { %1199 = vmatprep.subr.bf16.mxu1 %v1198_v38  ;;  %v403_v38 = vld [vmem:[#allocation2 + $0x130] sm:$0xff]  ;;  %v442_v53 = vld [vmem:[#allocation2 + $0x268] sm:$0xff]  ;;  %v468_v14 = vld [vmem:[#allocation2 + $0x338] sm:$0xff]  ;;  %v1360_v17 = vpack.c.bf16 %v459_v11, %v451_v10 }
  0x62   : > { %v1290_v60 = vpack.c.bf16 %v442_v53, %v434_v52  ;;  %v450_v0 = vld [vmem:[#allocation2 + $0x2a8] sm:$0xff]  ;;  %v476_v15 = vld [vmem:[#allocation2 + $0x378] sm:$0xff]  ;;  %v475_v24 = vld [vmem:[#allocation2 + $0x370] sm:$0xff] }
  0x63   : > { %1261 = vmatpush1.bf16.msra.mxu0 %v1260_v35  ;;  %v409_v35 = vld [vmem:[#allocation2 + $0x160] sm:$0xff]  ;;  %v458_v1 = vld [vmem:[#allocation2 + $0x2e8] sm:$0xff]  ;;  %v1362_v22 = vpack.c.bf16 %v476_v15, %v468_v14  ;;  %v508_v40 = vld [vmem:[#allocation2 + $0x478] sm:$0xff] }
  0x64   : > { %1263 = vmatprep.subr.bf16.mxu0 %v1262_v39  ;;  %1201 = vmatpush1.bf16.msra.mxu1 %v1200_v46  ;;  %v411_v39 = vld [vmem:[#allocation2 + $0x170] sm:$0xff]  ;;  %v1284_v44 = vpack.c.bf16 %v409_v35, %v401_v34  ;;  %v417_v46 = vld [vmem:[#allocation2 + $0x1a0] sm:$0xff]  ;;  %v1294_v8 = vpack.c.bf16 %v458_v1, %v450_v0  ;;  %v466_v12 = vld [vmem:[#allocation2 + $0x328] sm:$0xff] }
  0x65   : > { %1203 = vmatprep.subr.bf16.mxu1 %v1202_v50  ;;  %v1348_v45 = vpack.c.bf16 %v411_v39, %v403_v38  ;;  %v419_v50 = vld [vmem:[#allocation2 + $0x1b0] sm:$0xff]  ;;  %v474_v13 = vld [vmem:[#allocation2 + $0x368] sm:$0xff]  ;;  %v481_v31 = vld [vmem:[#allocation2 + $0x3a0] sm:$0xff] }
  0x66   : > { %v1298_v21 = vpack.c.bf16 %v474_v13, %v466_v12  ;;  %v482_v25 = vld [vmem:[#allocation2 + $0x3a8] sm:$0xff]  ;;  %v483_v35 = vld [vmem:[#allocation2 + $0x3b0] sm:$0xff]  ;;  %v500_v39 = vld [vmem:[#allocation2 + $0x438] sm:$0xff] }
  0x67   : > { %1265 = vmatpush1.bf16.msra.mxu0 %v1264_v47  ;;  %v425_v47 = vld [vmem:[#allocation2 + $0x1e0] sm:$0xff]  ;;  %v490_v26 = vld [vmem:[#allocation2 + $0x3e8] sm:$0xff]  ;;  %v524_v52 = vld [vmem:[#allocation2 + $0x4f8] sm:$0xff] }
  0x68   : > { %1267 = vmatprep.subr.bf16.mxu0 %v1266_v51  ;;  %1205 = vmatpush1.bf16.msra.mxu1 %v1204_v58  ;;  %v427_v51 = vld [vmem:[#allocation2 + $0x1f0] sm:$0xff]  ;;  %v1288_v56 = vpack.c.bf16 %v425_v47, %v417_v46  ;;  %v433_v58 = vld [vmem:[#allocation2 + $0x220] sm:$0xff]  ;;  %v506_v38 = vld [vmem:[#allocation2 + $0x468] sm:$0xff]  ;;  %v1370_v46 = vpack.c.bf16 %v508_v40, %v500_v39 }
  0x69   : > { %1207 = vmatprep.subr.bf16.mxu1 %v1206_v61  ;;  %v1352_v57 = vpack.c.bf16 %v427_v51, %v419_v50  ;;  %v1354_v61 = vpack.c.bf16 %v444_v55, %v436_v54  ;;  %v497_v43 = vld [vmem:[#allocation2 + $0x420] sm:$0xff]  ;;  %v499_v47 = vld [vmem:[#allocation2 + $0x430] sm:$0xff]  ;;  %v522_v50 = vld [vmem:[#allocation2 + $0x4e8] sm:$0xff] }
  0x6a   : > { %v516_v51 = vld [vmem:[#allocation2 + $0x4b8] sm:$0xff]  ;;  %v513_v55 = vld [vmem:[#allocation2 + $0x4a0] sm:$0xff]  ;;  %v554_v10 = vld [vmem:[#allocation2 + $0x5e8] sm:$0xff] }
  0x6b   : > { %1269 = vmatpush1.bf16.msra.mxu0 %v1268_v59  ;;  %v441_v59 = vld [vmem:[#allocation2 + $0x260] sm:$0xff]  ;;  %v540_v0 = vld [vmem:[#allocation2 + $0x578] sm:$0xff] }
  0x6c   : > { %1271 = vmatprep.subr.bf16.mxu0 %v1270_v62  ;;  %1209 = vmatpush1.bf16.msra.mxu1 %v1208_v2  ;;  %v435_v62 = vld [vmem:[#allocation2 + $0x230] sm:$0xff]  ;;  %v452_v2 = vld [vmem:[#allocation2 + $0x2b8] sm:$0xff]  ;;  %v1292_v4 = vpack.c.bf16 %v441_v59, %v433_v58  ;;  %v1374_v58 = vpack.c.bf16 %v524_v52, %v516_v51  ;;  %v545_v15 = vld [vmem:[#allocation2 + $0x5a0] sm:$0xff] }
  0x6d   : > { %1275 = vmatprep.subr.bf16.mxu1 %v1274_v7  ;;  %v1356_v5 = vpack.c.bf16 %v443_v63, %v435_v62  ;;  %v457_v7 = vld [vmem:[#allocation2 + $0x2e0] sm:$0xff]  ;;  %v515_v59 = vld [vmem:[#allocation2 + $0x4b0] sm:$0xff]  ;;  %v538_v62 = vld [vmem:[#allocation2 + $0x568] sm:$0xff] }
  0x6e   : > { %v1296_v16 = vpack.c.bf16 %v457_v7, %v449_v6  ;;  %v532_v63 = vld [vmem:[#allocation2 + $0x538] sm:$0xff]  ;;  %v531_v7 = vld [vmem:[#allocation2 + $0x530] sm:$0xff]  ;;  %v577_v40 = vld [vmem:[#allocation2 + $0x6a0] sm:$0xff] }
  0x6f   : > { %1273 = vmatpush1.bf16.msra.mxu0 %v1272_v3  ;;  %v460_v3 = vld [vmem:[#allocation2 + $0x2f8] sm:$0xff]  ;;  %v1378_v6 = vpack.c.bf16 %v540_v0, %v532_v63  ;;  %v593_v52 = vld [vmem:[#allocation2 + $0x720] sm:$0xff] }
  0x70   : > { %1339 = vmatprep.subr.bf16.mxu0 %v1338_v9  ;;  %v1358_v9 = vpack.c.bf16 %v460_v3, %v452_v2  ;;  %v529_v3 = vld [vmem:[#allocation2 + $0x520] sm:$0xff]  ;;  %v548_v11 = vld [vmem:[#allocation2 + $0x5b8] sm:$0xff] }
  0x71   : > { %v556_v12 = vld [vmem:[#allocation2 + $0x5f8] sm:$0xff]  ;;  %v609_v0 = vld [vmem:[#allocation2 + $0x7a0] sm:$0xff] }
 0x105   : > { %v1577_v18 = vpop.f32.mrb[0].mxu0 }
 0x106   : > { %v362_v23 = vpop.f32.mrb[1].mxu0 }
 0x107   : > { %685 = vmatprep.mubr.f32.mxu1 %v362_v23  ;;  %756 = vmatprep.mubr.f32.mxu0 %v362_v23 }
 0x108   : > { %686 = vmatmul.mubr.f32.vlgmr.msra.gmra.mrb[0].mxu1 %v1577_v18  ;;  %757 = vmatmul.mubr.f32.vlgmr.msra.gmra.mrb[2].mxu0 %v1577_v18 }
 0x109   : > { %1277 = vmatpush1.bf16.msra.mxu1 %v1276_v19  ;;  %1341 = vmatpush1.bf16.msra.mxu0 %v1340_v20  ;;  %v465_v19 = vld [vmem:[#allocation2 + $0x320] sm:$0xff] }
 0x10a   : > { %827 = vmatprep.mubr.f32.mxu1 %v362_v23  ;;  %898 = vmatprep.mubr.f32.mxu0 %v362_v23  ;;  %v473_v20 = vld [vmem:[#allocation2 + $0x360] sm:$0xff]  ;;  %v467_v23 = vld [vmem:[#allocation2 + $0x330] sm:$0xff] }
 0x10b   : > { %1279 = vmatprep.subr.bf16.mxu1 %v1278_v27  ;;  %1343 = vmatprep.subr.bf16.mxu0 %v1342_v28  ;;  %v484_v27 = vld [vmem:[#allocation2 + $0x3b8] sm:$0xff]  ;;  %v1300_v29 = vpack.c.bf16 %v473_v20, %v465_v19  ;;  %v1364_v30 = vpack.c.bf16 %v475_v24, %v467_v23  ;;  %v1382_v19 = vpack.c.bf16 %v556_v12, %v548_v11  ;;  %v547_v20 = vld [vmem:[#allocation2 + $0x5b0] sm:$0xff]  ;;  %v570_v23 = vld [vmem:[#allocation2 + $0x668] sm:$0xff] }
 0x10c   : > { %v492_v28 = vld [vmem:[#allocation2 + $0x3f8] sm:$0xff] }
 0x10d   : > { %1281 = vmatpush1.bf16.msra.mxu1 %v1280_v32  ;;  %1345 = vmatpush1.bf16.msra.mxu0 %v1344_v33  ;;  %v489_v32 = vld [vmem:[#allocation2 + $0x3e0] sm:$0xff]  ;;  %v1302_v33 = vpack.c.bf16 %v490_v26, %v482_v25  ;;  %v1366_v34 = vpack.c.bf16 %v492_v28, %v484_v27  ;;  %v564_v24 = vld [vmem:[#allocation2 + $0x638] sm:$0xff] }
 0x10e   : > { %1283 = vmatprep.subr.bf16.mxu1 %v1282_v36  ;;  %1347 = vmatprep.subr.bf16.mxu0 %v1346_v37  ;;  %v491_v36 = vld [vmem:[#allocation2 + $0x3f0] sm:$0xff]  ;;  %v498_v37 = vld [vmem:[#allocation2 + $0x428] sm:$0xff]  ;;  %v1304_v41 = vpack.c.bf16 %v489_v32, %v481_v31  ;;  %v572_v25 = vld [vmem:[#allocation2 + $0x678] sm:$0xff] }
 0x10f   : > { %v1368_v42 = vpack.c.bf16 %v491_v36, %v483_v35  ;;  %v561_v28 = vld [vmem:[#allocation2 + $0x620] sm:$0xff]  ;;  %v1386_v31 = vpack.c.bf16 %v572_v25, %v564_v24  ;;  %v563_v32 = vld [vmem:[#allocation2 + $0x630] sm:$0xff]  ;;  %v586_v35 = vld [vmem:[#allocation2 + $0x6e8] sm:$0xff] }
 0x110   : > { %v580_v36 = vld [vmem:[#allocation2 + $0x6b8] sm:$0xff] }
 0x111   : > { %1285 = vmatpush1.bf16.msra.mxu1 %v1284_v44  ;;  %1349 = vmatpush1.bf16.msra.mxu0 %v1348_v45  ;;  %v505_v44 = vld [vmem:[#allocation2 + $0x460] sm:$0xff]  ;;  %v1306_v45 = vpack.c.bf16 %v506_v38, %v498_v37  ;;  %v588_v37 = vld [vmem:[#allocation2 + $0x6f8] sm:$0xff] }
 0x112   : > { %1287 = vmatprep.subr.bf16.mxu1 %v1286_v48  ;;  %1351 = vmatprep.subr.bf16.mxu0 %v1350_v49  ;;  %v507_v48 = vld [vmem:[#allocation2 + $0x470] sm:$0xff]  ;;  %v514_v49 = vld [vmem:[#allocation2 + $0x4a8] sm:$0xff]  ;;  %v1308_v53 = vpack.c.bf16 %v505_v44, %v497_v43  ;;  %v1390_v43 = vpack.c.bf16 %v588_v37, %v580_v36 }
 0x113   : > { %v1372_v54 = vpack.c.bf16 %v507_v48, %v499_v47  ;;  %v579_v44 = vld [vmem:[#allocation2 + $0x6b0] sm:$0xff]  ;;  %v602_v47 = vld [vmem:[#allocation2 + $0x768] sm:$0xff]  ;;  %v596_v48 = vld [vmem:[#allocation2 + $0x738] sm:$0xff] }
 0x115   : > { %1289 = vmatpush1.bf16.msra.mxu1 %v1288_v56  ;;  %1353 = vmatpush1.bf16.msra.mxu0 %v1352_v57  ;;  %v521_v56 = vld [vmem:[#allocation2 + $0x4e0] sm:$0xff]  ;;  %v1310_v57 = vpack.c.bf16 %v522_v50, %v514_v49  ;;  %v604_v49 = vld [vmem:[#allocation2 + $0x778] sm:$0xff] }
 0x116   : > { %1291 = vmatprep.subr.bf16.mxu1 %v1290_v60  ;;  %1355 = vmatprep.subr.bf16.mxu0 %v1354_v61  ;;  %v523_v60 = vld [vmem:[#allocation2 + $0x4f0] sm:$0xff]  ;;  %v530_v61 = vld [vmem:[#allocation2 + $0x528] sm:$0xff]  ;;  %v1312_v1 = vpack.c.bf16 %v521_v56, %v513_v55  ;;  %v1394_v55 = vpack.c.bf16 %v604_v49, %v596_v48 }
 0x117   : > { %v1376_v2 = vpack.c.bf16 %v523_v60, %v515_v59  ;;  %v595_v56 = vld [vmem:[#allocation2 + $0x730] sm:$0xff]  ;;  %v618_v59 = vld [vmem:[#allocation2 + $0x7e8] sm:$0xff]  ;;  %v612_v60 = vld [vmem:[#allocation2 + $0x7b8] sm:$0xff] }
 0x119   : > { %1293 = vmatpush1.bf16.msra.mxu1 %v1292_v4  ;;  %1357 = vmatpush1.bf16.msra.mxu0 %v1356_v5  ;;  %v537_v4 = vld [vmem:[#allocation2 + $0x560] sm:$0xff]  ;;  %v1314_v5 = vpack.c.bf16 %v538_v62, %v530_v61  ;;  %v620_v61 = vld [vmem:[#allocation2 + $0x7f8] sm:$0xff] }
 0x11a   : > { %1295 = vmatprep.subr.bf16.mxu1 %v1294_v8  ;;  %1359 = vmatprep.subr.bf16.mxu0 %v1358_v9  ;;  %v539_v8 = vld [vmem:[#allocation2 + $0x570] sm:$0xff]  ;;  %v546_v9 = vld [vmem:[#allocation2 + $0x5a8] sm:$0xff]  ;;  %v1316_v13 = vpack.c.bf16 %v537_v4, %v529_v3  ;;  %v617_v3 = vld [vmem:[#allocation2 + $0x7e0] sm:$0xff] }
 0x11b   : > { %v1380_v14 = vpack.c.bf16 %v539_v8, %v531_v7  ;;  %v611_v4 = vld [vmem:[#allocation2 + $0x7b0] sm:$0xff] }
 0x11d   : > { %1297 = vmatpush1.bf16.msra.mxu1 %v1296_v16  ;;  %1361 = vmatpush1.bf16.msra.mxu0 %v1360_v17  ;;  %v553_v16 = vld [vmem:[#allocation2 + $0x5e0] sm:$0xff]  ;;  %v1318_v17 = vpack.c.bf16 %v554_v10, %v546_v9 }
 0x11e   : > { %1299 = vmatprep.subr.bf16.mxu1 %v1298_v21  ;;  %1363 = vmatprep.subr.bf16.mxu0 %v1362_v22  ;;  %v555_v21 = vld [vmem:[#allocation2 + $0x5f0] sm:$0xff]  ;;  %v562_v22 = vld [vmem:[#allocation2 + $0x628] sm:$0xff]  ;;  %v1320_v26 = vpack.c.bf16 %v553_v16, %v545_v15 }
 0x11f   : > { %v1384_v27 = vpack.c.bf16 %v555_v21, %v547_v20 }
 0x121   : > { %1301 = vmatpush1.bf16.msra.mxu1 %v1300_v29  ;;  %1365 = vmatpush1.bf16.msra.mxu0 %v1364_v30  ;;  %v569_v29 = vld [vmem:[#allocation2 + $0x660] sm:$0xff]  ;;  %v1322_v30 = vpack.c.bf16 %v570_v23, %v562_v22 }
 0x122   : > { %1303 = vmatprep.subr.bf16.mxu1 %v1302_v33  ;;  %1367 = vmatprep.subr.bf16.mxu0 %v1366_v34  ;;  %v571_v33 = vld [vmem:[#allocation2 + $0x670] sm:$0xff]  ;;  %v578_v34 = vld [vmem:[#allocation2 + $0x6a8] sm:$0xff]  ;;  %v1324_v38 = vpack.c.bf16 %v569_v29, %v561_v28 }
 0x123   : > { %v1388_v39 = vpack.c.bf16 %v571_v33, %v563_v32 }
 0x125   : > { %1305 = vmatpush1.bf16.msra.mxu1 %v1304_v41  ;;  %1369 = vmatpush1.bf16.msra.mxu0 %v1368_v42  ;;  %v585_v41 = vld [vmem:[#allocation2 + $0x6e0] sm:$0xff]  ;;  %v1326_v42 = vpack.c.bf16 %v586_v35, %v578_v34 }
 0x126   : > { %1307 = vmatprep.subr.bf16.mxu1 %v1306_v45  ;;  %1371 = vmatprep.subr.bf16.mxu0 %v1370_v46  ;;  %v587_v45 = vld [vmem:[#allocation2 + $0x6f0] sm:$0xff]  ;;  %v594_v46 = vld [vmem:[#allocation2 + $0x728] sm:$0xff]  ;;  %v1328_v50 = vpack.c.bf16 %v585_v41, %v577_v40 }
 0x127   : > { %v1392_v51 = vpack.c.bf16 %v587_v45, %v579_v44 }
 0x129   : > { %1309 = vmatpush1.bf16.msra.mxu1 %v1308_v53  ;;  %1373 = vmatpush1.bf16.msra.mxu0 %v1372_v54  ;;  %v601_v53 = vld [vmem:[#allocation2 + $0x760] sm:$0xff]  ;;  %v1330_v54 = vpack.c.bf16 %v602_v47, %v594_v46 }
 0x12a   : > { %1311 = vmatprep.subr.bf16.mxu1 %v1310_v57  ;;  %1375 = vmatprep.subr.bf16.mxu0 %v1374_v58  ;;  %v603_v57 = vld [vmem:[#allocation2 + $0x770] sm:$0xff]  ;;  %v610_v58 = vld [vmem:[#allocation2 + $0x7a8] sm:$0xff]  ;;  %v1332_v62 = vpack.c.bf16 %v601_v53, %v593_v52 }
 0x12b   : > { %v1396_v63 = vpack.c.bf16 %v603_v57, %v595_v56 }
 0x12d   : > { %1313 = vmatpush1.bf16.msra.mxu1 %v1312_v1  ;;  %1377 = vmatpush1.bf16.msra.mxu0 %v1376_v2  ;;  %v1334_v1 = vpack.c.bf16 %v618_v59, %v610_v58  ;;  %v1398_v2 = vpack.c.bf16 %v620_v61, %v612_v60 }
 0x12e   : > { %1315 = vmatprep.subr.bf16.mxu1 %v1314_v5  ;;  %1379 = vmatprep.subr.bf16.mxu0 %v1378_v6  ;;  %v619_v5 = vld [vmem:[#allocation2 + $0x7f0] sm:$0xff]  ;;  %v1336_v6 = vpack.c.bf16 %v617_v3, %v609_v0 }
 0x12f   : > { %v1400_v7 = vpack.c.bf16 %v619_v5, %v611_v4 }
 0x131   : > { %1317 = vmatpush1.bf16.msra.mxu1 %v1316_v13  ;;  %1381 = vmatpush1.bf16.msra.mxu0 %v1380_v14 }
 0x132   : > { %1319 = vmatprep.subr.bf16.mxu1 %v1318_v17  ;;  %1383 = vmatprep.subr.bf16.mxu0 %v1382_v19 }
 0x135   : > { %1321 = vmatpush1.bf16.msra.mxu1 %v1320_v26  ;;  %1385 = vmatpush1.bf16.msra.mxu0 %v1384_v27 }
 0x136   : > { %1323 = vmatprep.subr.bf16.mxu1 %v1322_v30  ;;  %1387 = vmatprep.subr.bf16.mxu0 %v1386_v31 }
 0x139   : > { %1325 = vmatpush1.bf16.msra.mxu1 %v1324_v38  ;;  %1389 = vmatpush1.bf16.msra.mxu0 %v1388_v39 }
 0x13a   : > { %1327 = vmatprep.subr.bf16.mxu1 %v1326_v42  ;;  %1391 = vmatprep.subr.bf16.mxu0 %v1390_v43 }
 0x13d   : > { %1329 = vmatpush1.bf16.msra.mxu1 %v1328_v50  ;;  %1393 = vmatpush1.bf16.msra.mxu0 %v1392_v51 }
 0x13e   : > { %1331 = vmatprep.subr.bf16.mxu1 %v1330_v54  ;;  %1395 = vmatprep.subr.bf16.mxu0 %v1394_v55 }
 0x141   : > { %1333 = vmatpush1.bf16.msra.mxu1 %v1332_v62  ;;  %1397 = vmatpush1.bf16.msra.mxu0 %v1396_v63 }
 0x142   : > { %1335 = vmatprep.subr.bf16.mxu1 %v1334_v1  ;;  %1399 = vmatprep.subr.bf16.mxu0 %v1398_v2  ;;  %v1484_v2 = vmov 0  }
 0x143   : > { %1432 = vset.pattern.permute.xlu1 %v1484_v2  ;;  %1433 = vset.pattern.permute.xlu0 %v1484_v2 }
 0x145   : > { %1337 = vmatpush1.bf16.msra.mxu1 %v1336_v6  ;;  %1401 = vmatpush1.bf16.msra.mxu0 %v1400_v7  ;;  %v971_v7 = vld [vmem:[%s1670_s3] sm:$0xf] }
 0x148   : > { %828 = vmatmul.mubr.f32.vlgmr.msra.gmra.mrb[2].mxu1 %v1577_v18  ;;  %899 = vmatmul.mubr.f32.vlgmr.msra.gmra.mrb[4].mxu0 %v1577_v18 }
 0x1db   : > { %v1583_v8 = vpop.f32.mrb[0].mxu1  ;;  %v1585_v9 = vpop.f32.mrb[2].mxu0 }
 0x1dc   : > { %v906_v10 = vsel %vm905_vm1, %v1583_v8, 0.0  ;;  %v930_v11 = vmul.f32 %v1583_v8, %v1583_v8  ;;  %v1591_v12 = vpop.f32.mrb[1].mxu1  ;;  %v1593_v13 = vpop.f32.mrb[3].mxu0  ;;  %v932_v14 = vmul.f32 %v1585_v9, %v1585_v9  ;;  %v909_v19 = vsel %vm905_vm1, %v1585_v9, 0.0 }
 0x1dd   : > { %v907_v18 = vsel %vm905_vm1, %v1591_v12, 0.0  ;;  %v931_v15 = vmul.f32 %v1591_v12, %v1591_v12  ;;  %v933_v21 = vmul.f32 %v1593_v13, %v1593_v13  ;;  %v911_v25 = vsel %vm905_vm1, %v1593_v13, 0.0 }
 0x1de   : > { %v938_v16 = vsel %vm905_vm1, %v930_v11, 0.0  ;;  %v908_v17 = vadd.f32 %v907_v18, %v906_v10  ;;  %v941_v24 = vsel %vm905_vm1, %v932_v14, 0.0  ;;  %v974_v18 = vld [vmem:[%s1671_s4] sm:$0xf] }
 0x1df   : > { %v939_v20 = vsel %vm905_vm1, %v931_v15, 0.0  ;;  %v943_v28 = vsel %vm905_vm1, %v933_v21, 0.0  ;;  %v1007_v21 = vld [vmem:[%s281_s16 + $0x18] sm:$0xff] }
 0x1e0   : > { %v940_v22 = vadd.f32 %v939_v20, %v938_v16  ;;  %v910_v23 = vadd.f32 %v909_v19, %v908_v17  ;;  %v1004_v17 = vld [vmem:[%s281_s16] sm:$0xff]  ;;  %v1005_v19 = vld [vmem:[%s281_s16 + $0x8] sm:$0xff]  ;;  %v1006_v20 = vld [vmem:[%s281_s16 + $0x10] sm:$0xff] }
 0x1e2   : > { %v912_v26 = vadd.f32 %v911_v25, %v910_v23  ;;  %v942_v27 = vadd.f32 %v941_v24, %v940_v22  ;;  %v1012_v23 = vcombine.high %v1004_v17, %v1004_v17  ;;  %v1013_v24 = vcombine.high %v1005_v19, %v1005_v19 }
 0x1e3   : > { %v1014_v25 = vcombine.high %v1006_v20, %v1006_v20 }
 0x1e4   : > { %v944_v29 = vadd.f32 %v943_v28, %v942_v27 }
 0x21b   : > { %v1611_v30 = vpop.f32.mrb[2].mxu1  ;;  %v1613_v31 = vpop.f32.mrb[4].mxu0 }
 0x21c   : > { %v913_v32 = vsel %vm905_vm1, %v1611_v30, 0.0  ;;  %v934_v33 = vmul.f32 %v1611_v30, %v1611_v30  ;;  %v1619_v34 = vpop.f32.mrb[3].mxu1  ;;  %v1621_v35 = vpop.f32.mrb[5].mxu0  ;;  %v936_v40 = vmul.f32 %v1613_v31, %v1613_v31  ;;  %v917_v45 = vsel %vm905_vm1, %v1613_v31, 0.0 }
 0x21d   : > { %v914_v36 = vadd.f32 %v913_v32, %v912_v26  ;;  %v915_v37 = vsel %vm905_vm1, %v1619_v34, 0.0  ;;  %v935_v38 = vmul.f32 %v1619_v34, %v1619_v34  ;;  %v937_v44 = vmul.f32 %v1621_v35, %v1621_v35 }
 0x21e   : > { %v945_v39 = vsel %vm905_vm1, %v934_v33, 0.0  ;;  %v919_v48 = vsel %vm905_vm1, %v1621_v35, 0.0  ;;  %v949_v49 = vsel %vm905_vm1, %v936_v40, 0.0  ;;  %v1015_v26 = vcombine.high %v1007_v21, %v1007_v21 }
 0x21f   : > { %v946_v41 = vadd.f32 %v945_v39, %v944_v29  ;;  %v916_v42 = vadd.f32 %v915_v37, %v914_v36  ;;  %v947_v43 = vsel %vm905_vm1, %v935_v38, 0.0  ;;  %v951_v52 = vsel %vm905_vm1, %v937_v44, 0.0 }
 0x221   : > { %v948_v46 = vadd.f32 %v947_v43, %v946_v41  ;;  %v918_v47 = vadd.f32 %v917_v45, %v916_v42 }
 0x223   : > { %v920_v50 = vadd.f32 %v919_v48, %v918_v47  ;;  %v950_v51 = vadd.f32 %v949_v49, %v948_v46 }
 0x225   : > { %921 = vadd.xlane.f32.xlu0 %v920_v50  ;;  %v952_v53 = vadd.f32 %v951_v52, %v950_v51 }
 0x229   : > { %953 = vadd.xlane.f32.xlu0 %v952_v53 }
 0x2b2   : > { %v922_v54 = vpop.xlane.xlu0 %921 }
 0x2b3   : > { %v923_v55 = vrot.slane %v922_v54, 4 }
 0x2b5   : > { %v924_v56 = vadd.f32 %v923_v55, %v922_v54 }
 0x2b6   : > { %v954_v57 = vpop.xlane.xlu0 %953 }
 0x2b7   : > { %v925_v58 = vrot.slane %v924_v56, 2  ;;  %v955_v59 = vrot.slane %v954_v57, 4 }
 0x2b9   : > { %v956_v60 = vadd.f32 %v955_v59, %v954_v57  ;;  %v926_v61 = vadd.f32 %v925_v58, %v924_v56 }
 0x2bb   : > { %v957_v62 = vrot.slane %v956_v60, 2  ;;  %v927_v63 = vrot.slane %v926_v61, 1 }
 0x2bd   : > { %v958_v0 = vadd.f32 %v957_v62, %v956_v60  ;;  %v928_v1 = vadd.f32 %v927_v63, %v926_v61 }
 0x2bf   : > { %1402 = vpush %v928_v1  ;;  %v959_v3 = vrot.slane %v958_v0, 1 }
 0x2c1   : > { %v960_v4 = vadd.f32 %v959_v3, %v958_v0 }
 0x2c3   : > { %1404 = vpush %v960_v4 }
 0x2f0   : > { %s1403_s23 = spop %1402 }
 0x2f1   : > { %s962_s24 = smul.f32 0.00024414063, %s1403_s23 }
 0x2f3   : > { %s964_s25 = smul.f32 %s962_s24, %s962_s24  ;;  %v975_v14 = vstv %s962_s24 }
 0x2f4   : > { %s1405_s26 = spop %1404 }
 0x2f5   : > { %s963_s27 = smul.f32 0.00024414063, %s1405_s26 }
 0x2f7   : > { %s965_s28 = ssub.f32 %s963_s27, %s964_s25 }
 0x2f9   : > { %s966_s30 = smax.f32 %s1485_s29, %s965_s28 }
 0x2fa   : > { %s967_s7 = sadd.f32 1e-05, %s966_s30 }
 0x2fc   : > { %v968_v5 = vstv %s967_s7 }
 0x2fd   : > { %1438 = vrsqrt.f32 %v968_v5 }
 0x307   : > { %v1439_v6 = vpop.eup %1438 }
 0x308   : > { %1406 = vpush %v1439_v6 }
 0x339   : > { %s1407_s10 = spop %1406 }
 0x33a   : > { %v972_v10 = vstv %s1407_s10 }
 0x33b   : > { %v973_v11 = vmul.f32 %v972_v10, %v971_v7 }
 0x33d   : > { %v976_v15 = vmul.f32 %v975_v14, %v973_v11  ;;  %980 = vperm.xlu1 %1432, %v973_v11  }
 0x33f   : > { %v977_v16 = vsub.f32 %v974_v18, %v976_v15 }
 0x341   : > { %993 = vperm.xlu1 %1432, %v977_v16  }
 0x3bc   : > { %v981_v22 = vpop.permute.xlu1 %980 }
 0x3bd   : > { %v983_v27 = vmul.f32 %v981_v22, %v1583_v8  ;;  %v984_v28 = vmul.f32 %v981_v22, %v1591_v12  ;;  %v985_v29 = vmul.f32 %v981_v22, %v1585_v9  ;;  %v986_v32 = vmul.f32 %v981_v22, %v1593_v13 }
 0x3be   : > { %v987_v33 = vmul.f32 %v981_v22, %v1611_v30  ;;  %v988_v36 = vmul.f32 %v981_v22, %v1619_v34  ;;  %v989_v37 = vmul.f32 %v981_v22, %v1613_v31  ;;  %v990_v38 = vmul.f32 %v981_v22, %v1621_v35 }
 0x3c0   : > { %v994_v39 = vpop.permute.xlu1 %993 }
 0x3c1   : > { %v996_v40 = vadd.f32 %v994_v39, %v983_v27  ;;  %v997_v41 = vadd.f32 %v994_v39, %v984_v28  ;;  %v998_v42 = vadd.f32 %v994_v39, %v985_v29  ;;  %v999_v8 = vadd.f32 %v994_v39, %v986_v32 }
 0x3c2   : > { %v1000_v43 = vadd.f32 %v994_v39, %v987_v33  ;;  %v1001_v12 = vadd.f32 %v994_v39, %v988_v36  ;;  %v1002_v44 = vadd.f32 %v994_v39, %v989_v37  ;;  %v1003_v9 = vadd.f32 %v994_v39, %v990_v38 }
 0x3c3   : > { %v1020_v45 = vadd.f32 %v1004_v17, %v996_v40  ;;  %v1021_v13 = vadd.f32 %v1012_v23, %v997_v41  ;;  %v1022_v46 = vadd.f32 %v1005_v19, %v998_v42  ;;  %v1023_v30 = vadd.f32 %v1013_v24, %v999_v8 }
 0x3c4   : > { %v1024_v31 = vadd.f32 %v1006_v20, %v1000_v43  ;;  %v1025_v34 = vadd.f32 %v1014_v25, %v1001_v12  ;;  %v1026_v35 = vadd.f32 %v1007_v21, %v1002_v44  ;;  %v1027_v47 = vadd.f32 %v1015_v26, %v1003_v9 }
 0x3c5   : > { %v1036_v48 = vcombine.low %v1020_v45, %v1021_v13  ;;  %v1037_v49 = vcombine.low %v1022_v46, %v1023_v30 }
 0x3c6   : > { %v1038_v50 = vcombine.low %v1024_v31, %v1025_v34  ;;  %v1039_v51 = vcombine.low %v1026_v35, %v1027_v47 }
 0x3c7   : > { %1044 = vst [vmem:[%s286_s19] sm:$0xff] %v1036_v48  ;;  %1045 = vst [vmem:[%s286_s19 + $0x8] sm:$0xff] %v1037_v49 }
 0x3c8   : > { %1046 = vst [vmem:[%s286_s19 + $0x10] sm:$0xff] %v1038_v50  ;;  %1047 = vst [vmem:[%s286_s19 + $0x18] sm:$0xff] %v1039_v51 }
 0x3c9 PF: > { %s17_s21 = sadd.s32 1, %s1478_s21  }
 0x3ca   : > { %p14_p3 = scmp.ge.s32.totalorder %s17_s21, 4  }
 0x3cc   :  { %16 = sbr.rel (!%p14_p3) target bundleno = 1 (0x1), region = 82 }
 0x3d3   :  { %1069 = vsyncpa [#allocation3], 1 }
 0x3d4   :  { %1071 = vsyncpa [#allocation3 + $0x1], 1 }

</bundles_post_ra>
